<compile_context>
chip_gen: v6e
topology: v6e:2x2x1
jax: 0.10.0
libtpu: 0.0.40
codegen_flags: <defaults>
</compile_context>

<pallas_src>
import functools

import jax
import jax.numpy as jnp
from jax import lax
from jax.experimental import pallas as pl
from jax.experimental.pallas import tpu as pltpu

MARGIN = 1.0
EPS = 1e-9

_LANES = 128
_SUBLANES = 8
_TARGET_BYTES_PER_BUFFER = 2 << 20   # ~2 MiB of embedding data per input tile


def _round_up(x, m):
    return ((x + m - 1) // m) * m


def _cdiv(a, b):
    return -(-a // b)


def _vmem_capacity_bytes():
    """Physical VMEM per TensorCore; safe fallback if query is unavailable."""
    try:
        info = pltpu.get_tpu_info()
        cap = getattr(info, "vmem_capacity_bytes", None)
        if cap:
            return int(cap)
    except Exception:
        pass
    return 64 << 20


def _loss_kernel(flag_ref, c1_ref, c2_ref, p1_ref, p2_ref, out_ref, *,
                 tile_b, b_total, margin, eps):
    """One batch tile.

    flag_ref        : (TB, 1)  f32   1.0 = same class, 0.0 = different class
    c1/c2/p1/p2_ref : (TB, D)  native dtype (upcast to f32 in-kernel)
    out_ref         : (1, 8, 128) f32, raw partial sums at [0, 0, 0:3]
    """
    f32 = jnp.float32
    c1 = c1_ref[...].astype(f32)
    c2 = c2_ref[...].astype(f32)
    p1 = p1_ref[...].astype(f32)
    p2 = p2_ref[...].astype(f32)
    flag = flag_ref[...]                                         # (TB, 1) f32

    # Validity mask for padded tail rows (B padded up to num_tiles * tile_b).
    row = (pl.program_id(0) * tile_b
           + lax.broadcasted_iota(jnp.int32, flag.shape, 0))     # (TB, 1)
    valid = (row < b_total).astype(f32)

    # Per-sample squared-distance reductions over the feature dim (VPU + XLU).
    d_c = jnp.sum((c1 - c2) ** 2, axis=1, keepdims=True)         # (TB, 1)
    d_p = jnp.sum((p1 - p2) ** 2, axis=1, keepdims=True)         # (TB, 1)
    d_cp1 = jnp.sqrt(jnp.sum((c1 - p1) ** 2, axis=1, keepdims=True) + eps)
    d_cp2 = jnp.sqrt(jnp.sum((c2 - p2) ** 2, axis=1, keepdims=True) + eps)
    d_d = (d_cp1 - d_cp2) ** 2                                   # (TB, 1)

    losses_c_same = d_c
    losses_c_diff = jnp.maximum(margin - jnp.sqrt(d_c + eps), 0.0) ** 2
    losses_c = flag * losses_c_same + (1.0 - flag) * losses_c_diff

    # Raw per-tile sums (masked); the single 1/B scale happens in the wrapper.
    s_c = jnp.sum(valid * losses_c)
    s_p = jnp.sum(valid * d_p)
    s_d = jnp.sum(valid * d_d)

    # Place the three scalars at lanes 0..2 of sublane 0; zero elsewhere.
    shape = out_ref.shape                                        # (1, 8, 128)
    lane = lax.broadcasted_iota(jnp.int32, shape, 2)
    sub0 = lax.broadcasted_iota(jnp.int32, shape, 1) == 0
    vals = jnp.where(lane == 1, s_p, jnp.where(lane == 2, s_d, s_c))
    out_ref[...] = jnp.where(sub0 & (lane < 3), vals, jnp.float32(0.0))


def contrastive_loss_as(flag, output_c1, output_c2, output_p1, output_p2, *,
                        margin=MARGIN, eps=EPS, size_average=True,
                        tile_b=None):
    """Pallas port of ContrastiveLoss_AS.forward.

    Returns (losses_c.mean(), losses_p.mean(), losses_d.mean()) when
    size_average=True, else losses_p.sum() (matching the PyTorch module).
    """
    B, D = output_c1.shape
    f32 = jnp.float32

    flag2d = flag.reshape(B, 1).astype(f32)
    c1, c2, p1, p2 = output_c1, output_c2, output_p1, output_p2  # native dtype

    # --- dtype-aware per-row VMEM footprint (lane-padded). ---
    itemsize = jnp.dtype(c1.dtype).itemsize
    emb_row_bytes = _round_up(D, _LANES) * itemsize              # per array
    bytes_per_row = 4 * emb_row_bytes + _LANES * 4               # + f32 flag

    # --- generation-aware VMEM budget. ---
    vmem_cap = _vmem_capacity_bytes()
    if vmem_cap >= (100 << 20):          # v5e / v6e: 128 MiB physical VMEM
        vmem_budget = 80 << 20
        vmem_limit_cap = 96 << 20
    else:                                # v7x: 64 MiB physical VMEM per TC
        vmem_budget = 40 << 20
        vmem_limit_cap = 48 << 20

    # --- bytes-targeted batch tile (multiple of 8, VMEM-clamped). ---
    if tile_b is None:
        tile_b = _TARGET_BYTES_PER_BUFFER // max(emb_row_bytes, 1)
        tile_b = min(tile_b, vmem_budget // (2 * bytes_per_row))
        tile_b = max(_SUBLANES, (tile_b // _SUBLANES) * _SUBLANES)
    tile_b = int(max(_SUBLANES, min(tile_b, _round_up(B, _SUBLANES))))

    num_tiles = _cdiv(B, tile_b)
    # Guarantee >= 2 grid steps whenever possible (megacore sharding, overlap).
    if num_tiles < 2 and B > _SUBLANES:
        tile_b = _round_up(_cdiv(B, 2), _SUBLANES)
        num_tiles = _cdiv(B, tile_b)

    # Pad the batch to a multiple of tile_b; padded rows are masked in-kernel.
    b_pad = num_tiles * tile_b
    if b_pad != B:
        pad = ((0, b_pad - B), (0, 0))
        flag2d = jnp.pad(flag2d, pad)
        c1 = jnp.pad(c1, pad)
        c2 = jnp.pad(c2, pad)
        p1 = jnp.pad(p1, pad)
        p2 = jnp.pad(p2, pad)

    flag_spec = pl.BlockSpec((tile_b, 1), lambda i: (i, 0))
    emb_specs = [pl.BlockSpec((tile_b, D), lambda i: (i, 0)) for _ in range(4)]
    out_spec = pl.BlockSpec((1, _SUBLANES, _LANES), lambda i: (i, 0, 0))

    # Explicit VMEM limit: double-buffered inputs + output tiles + slack,
    # bounded by the generation-specific cap.
    need = 2 * tile_b * bytes_per_row + 2 * (_SUBLANES * _LANES * 4)
    vmem_limit = int(min(max(2 * need, 32 << 20), vmem_limit_cap))

    kernel = functools.partial(_loss_kernel, tile_b=tile_b, b_total=B,
                               margin=float(margin), eps=float(eps))

    partial = pl.pallas_call(
        kernel,
        out_shape=jax.ShapeDtypeStruct((num_tiles, _SUBLANES, _LANES), f32),
        grid_spec=pltpu.PrefetchScalarGridSpec(
            num_scalar_prefetch=0,
            grid=(num_tiles,),
            in_specs=[flag_spec] + emb_specs,
            out_specs=out_spec,
        ),
        compiler_params=pltpu.CompilerParams(
            dimension_semantics=("parallel",),
            vmem_limit_bytes=vmem_limit),
    )(flag2d, c1, c2, p1, p2)

    # Tiny cross-tile reduction + single 1/B scale in the wrapper (keeps the
    # kernel accumulation-free so the grid axis can shard across TensorCores).
    s_c = jnp.sum(partial[:, 0, 0])
    s_p = jnp.sum(partial[:, 0, 1])
    s_d = jnp.sum(partial[:, 0, 2])

    if size_average:
        inv_b = 1.0 / float(B)
        return s_c * inv_b, s_p * inv_b, s_d * inv_b
    # PyTorch module returns losses.sum() with losses = losses_p.
    return s_p


def _reference(flag, c1, c2, p1, p2, margin=MARGIN, eps=EPS):
    c1 = c1.astype(jnp.float32); c2 = c2.astype(jnp.float32)
    p1 = p1.astype(jnp.float32); p2 = p2.astype(jnp.float32)
    flag = flag.astype(jnp.float32)
    d_c = jnp.sum((c1 - c2) ** 2, axis=1)
    d_p = jnp.sum((p1 - p2) ** 2, axis=1)
    d_d = (jnp.sqrt(jnp.sum((c1 - p1) ** 2, axis=1) + eps)
           - jnp.sqrt(jnp.sum((c2 - p2) ** 2, axis=1) + eps)) ** 2
    l_c = flag * d_c + (1 - flag) * jnp.maximum(
        margin - jnp.sqrt(d_c + eps), 0.0) ** 2
    return l_c.mean(), d_p.mean(), d_d.mean()


def _make_inputs(key, b, d, dtype):
    k1, k2, k3, k4, k5 = jax.random.split(key, 5)
    c1 = jax.random.normal(k1, (b, d), dtype=jnp.float32).astype(dtype)
    c2 = jax.random.normal(k2, (b, d), dtype=jnp.float32).astype(dtype)
    p1 = jax.random.normal(k3, (b, d), dtype=jnp.float32).astype(dtype)
    p2 = jax.random.normal(k4, (b, d), dtype=jnp.float32).astype(dtype)
    flag = (jax.random.uniform(k5, (b,)) > 0.5).astype(jnp.float32)
    return flag, c1, c2, p1, p2


if __name__ == "__main__":
    key = jax.random.PRNGKey(0)
    k_a, k_b, k_c = jax.random.split(key, 3)

    # 1) Even batch, f32.
    flag, c1, c2, p1, p2 = _make_inputs(k_a, 16, 32, jnp.float32)
    lc, lp, ld = contrastive_loss_as(flag, c1, c2, p1, p2)
    jax.block_until_ready((lc, lp, ld))
    rc, rp, rd = _reference(flag, c1, c2, p1, p2)
    assert jnp.allclose(lc, rc, atol=1e-5, rtol=1e-5), (lc, rc)
    assert jnp.allclose(lp, rp, atol=1e-5, rtol=1e-5), (lp, rp)
    assert jnp.allclose(ld, rd, atol=1e-5, rtol=1e-5), (ld, rd)

    # 2) Ragged batch (exercises pad + in-kernel mask path).
    flag, c1, c2, p1, p2 = _make_inputs(k_b, 13, 32, jnp.float32)
    lc, lp, ld = contrastive_loss_as(flag, c1, c2, p1, p2)
    jax.block_until_ready((lc, lp, ld))
    rc, rp, rd = _reference(flag, c1, c2, p1, p2)
    assert jnp.allclose(lc, rc, atol=1e-5, rtol=1e-5), (lc, rc)
    assert jnp.allclose(lp, rp, atol=1e-5, rtol=1e-5), (lp, rp)
    assert jnp.allclose(ld, rd, atol=1e-5, rtol=1e-5), (ld, rd)

    # 3) bf16 inputs (exercises native-dtype streaming + in-kernel upcast).
    flag, c1, c2, p1, p2 = _make_inputs(k_c, 16, 32, jnp.bfloat16)
    lc, lp, ld = contrastive_loss_as(flag, c1, c2, p1, p2)
    jax.block_until_ready((lc, lp, ld))
    rc, rp, rd = _reference(flag, c1, c2, p1, p2)
    assert jnp.allclose(lc, rc, atol=1e-2, rtol=1e-2), (lc, rc)
    assert jnp.allclose(lp, rp, atol=1e-2, rtol=1e-2), (lp, rp)
    assert jnp.allclose(ld, rd, atol=1e-2, rtol=1e-2), (ld, rd)

    print("KERNEL_OK")
</pallas_src>

<mosaic_0001>
module attributes {stable_mosaic.version = 11 : i64} {
  func.func @_loss_kernel(%arg0: i32, %arg1: memref<8x1xf32, #tpu.memory_space<vmem>>, %arg2: memref<8x32xf32, #tpu.memory_space<vmem>>, %arg3: memref<8x32xf32, #tpu.memory_space<vmem>>, %arg4: memref<8x32xf32, #tpu.memory_space<vmem>>, %arg5: memref<8x32xf32, #tpu.memory_space<vmem>>, %arg6: memref<1x8x128xf32, #tpu.memory_space<vmem>>) attributes {dimension_semantics = [#tpu.dimension_semantics<parallel>], iteration_bounds = array<i64: 2>, scalar_prefetch = 0 : i64, scratch_operands = 0 : i64, tpu.core_type = #tpu.core_type<tc>, window_params = [{transform_indices = @transform_0, window_bounds = array<i64: 8, 1>}, {transform_indices = @transform_1, window_bounds = array<i64: 8, 32>}, {transform_indices = @transform_2, window_bounds = array<i64: 8, 32>}, {transform_indices = @transform_3, window_bounds = array<i64: 8, 32>}, {transform_indices = @transform_4, window_bounds = array<i64: 8, 32>}, {transform_indices = @transform_5, window_bounds = array<i64: 1, 8, 128>}]} {
    %c0 = arith.constant 0 : index
    %c0_0 = arith.constant 0 : index
    %0 = vector.load %arg2[%c0, %c0_0] : memref<8x32xf32, #tpu.memory_space<vmem>>, vector<8x32xf32>
    %c0_1 = arith.constant 0 : index
    %c0_2 = arith.constant 0 : index
    %1 = vector.load %arg3[%c0_1, %c0_2] : memref<8x32xf32, #tpu.memory_space<vmem>>, vector<8x32xf32>
    %c0_3 = arith.constant 0 : index
    %c0_4 = arith.constant 0 : index
    %2 = vector.load %arg4[%c0_3, %c0_4] : memref<8x32xf32, #tpu.memory_space<vmem>>, vector<8x32xf32>
    %c0_5 = arith.constant 0 : index
    %c0_6 = arith.constant 0 : index
    %3 = vector.load %arg5[%c0_5, %c0_6] : memref<8x32xf32, #tpu.memory_space<vmem>>, vector<8x32xf32>
    %c0_7 = arith.constant 0 : index
    %c0_8 = arith.constant 0 : index
    %4 = vector.load %arg1[%c0_7, %c0_8] : memref<8x1xf32, #tpu.memory_space<vmem>>, vector<8x1xf32>
    %c8_i32 = arith.constant 8 : i32
    %5 = arith.muli %arg0, %c8_i32 : i32
    %6 = tpu.iota {dimensions = array<i32: 0>} : vector<8x1xi32>
    %7 = vector.broadcast %5 : i32 to vector<8x1xi32>
    %8 = arith.addi %7, %6 : vector<8x1xi32>
    %c16_i32 = arith.constant 16 : i32
    %9 = vector.broadcast %c16_i32 : i32 to vector<8x1xi32>
    %10 = arith.cmpi slt, %8, %9 : vector<8x1xi32>
    %11 = arith.extui %10 : vector<8x1xi1> to vector<8x1xi32>
    %12 = arith.sitofp %11 : vector<8x1xi32> to vector<8x1xf32>
    %13 = arith.subf %0, %1 : vector<8x32xf32>
    %14 = arith.mulf %13, %13 : vector<8x32xf32>
    %cst = arith.constant dense<0.000000e+00> : vector<8xf32>
    %15 = vector.multi_reduction <add>, %14, %cst [1] : vector<8x32xf32> to vector<8xf32>
    %16 = vector.shape_cast %15 : vector<8xf32> to vector<8x1xf32>
    %17 = arith.subf %2, %3 : vector<8x32xf32>
    %18 = arith.mulf %17, %17 : vector<8x32xf32>
    %cst_9 = arith.constant dense<0.000000e+00> : vector<8xf32>
    %19 = vector.multi_reduction <add>, %18, %cst_9 [1] : vector<8x32xf32> to vector<8xf32>
    %20 = vector.shape_cast %19 : vector<8xf32> to vector<8x1xf32>
    %21 = arith.subf %0, %2 : vector<8x32xf32>
    %22 = arith.mulf %21, %21 : vector<8x32xf32>
    %cst_10 = arith.constant dense<0.000000e+00> : vector<8xf32>
    %23 = vector.multi_reduction <add>, %22, %cst_10 [1] : vector<8x32xf32> to vector<8xf32>
    %24 = vector.shape_cast %23 : vector<8xf32> to vector<8x1xf32>
    %cst_11 = arith.constant 9.99999971E-10 : f32
    %25 = vector.broadcast %cst_11 : f32 to vector<8x1xf32>
    %26 = arith.addf %24, %25 : vector<8x1xf32>
    %27 = math.sqrt %26 : vector<8x1xf32>
    %28 = arith.subf %1, %3 : vector<8x32xf32>
    %29 = arith.mulf %28, %28 : vector<8x32xf32>
    %cst_12 = arith.constant dense<0.000000e+00> : vector<8xf32>
    %30 = vector.multi_reduction <add>, %29, %cst_12 [1] : vector<8x32xf32> to vector<8xf32>
    %31 = vector.shape_cast %30 : vector<8xf32> to vector<8x1xf32>
    %cst_13 = arith.constant 9.99999971E-10 : f32
    %32 = vector.broadcast %cst_13 : f32 to vector<8x1xf32>
    %33 = arith.addf %31, %32 : vector<8x1xf32>
    %34 = math.sqrt %33 : vector<8x1xf32>
    %35 = arith.subf %27, %34 : vector<8x1xf32>
    %36 = arith.mulf %35, %35 : vector<8x1xf32>
    %cst_14 = arith.constant 9.99999971E-10 : f32
    %37 = vector.broadcast %cst_14 : f32 to vector<8x1xf32>
    %38 = arith.addf %16, %37 : vector<8x1xf32>
    %39 = math.sqrt %38 : vector<8x1xf32>
    %cst_15 = arith.constant 1.000000e+00 : f32
    %40 = vector.broadcast %cst_15 : f32 to vector<8x1xf32>
    %41 = arith.subf %40, %39 : vector<8x1xf32>
    %cst_16 = arith.constant 0.000000e+00 : f32
    %42 = vector.broadcast %cst_16 : f32 to vector<8x1xf32>
    %43 = arith.maximumf %41, %42 : vector<8x1xf32>
    %44 = arith.mulf %43, %43 : vector<8x1xf32>
    %45 = arith.mulf %4, %16 : vector<8x1xf32>
    %cst_17 = arith.constant 1.000000e+00 : f32
    %46 = vector.broadcast %cst_17 : f32 to vector<8x1xf32>
    %47 = arith.subf %46, %4 : vector<8x1xf32>
    %48 = arith.mulf %47, %44 : vector<8x1xf32>
    %49 = arith.addf %45, %48 : vector<8x1xf32>
    %50 = arith.mulf %12, %49 : vector<8x1xf32>
    %51 = vector.shape_cast %50 : vector<8x1xf32> to vector<1x8x1xf32>
    %cst_18 = arith.constant dense<0.000000e+00> : vector<1xf32>
    %52 = vector.multi_reduction <add>, %51, %cst_18 [1, 2] : vector<1x8x1xf32> to vector<1xf32>
    %53 = vector.shape_cast %52 : vector<1xf32> to vector<1x1x1xf32>
    %54 = vector.extract %53[0, 0, 0] : f32 from vector<1x1x1xf32>
    %55 = arith.mulf %12, %20 : vector<8x1xf32>
    %56 = vector.shape_cast %55 : vector<8x1xf32> to vector<1x8x1xf32>
    %cst_19 = arith.constant dense<0.000000e+00> : vector<1xf32>
    %57 = vector.multi_reduction <add>, %56, %cst_19 [1, 2] : vector<1x8x1xf32> to vector<1xf32>
    %58 = vector.shape_cast %57 : vector<1xf32> to vector<1x1x1xf32>
    %59 = vector.extract %58[0, 0, 0] : f32 from vector<1x1x1xf32>
    %60 = arith.mulf %12, %36 : vector<8x1xf32>
    %61 = vector.shape_cast %60 : vector<8x1xf32> to vector<1x8x1xf32>
    %cst_20 = arith.constant dense<0.000000e+00> : vector<1xf32>
    %62 = vector.multi_reduction <add>, %61, %cst_20 [1, 2] : vector<1x8x1xf32> to vector<1xf32>
    %63 = vector.shape_cast %62 : vector<1xf32> to vector<1x1x1xf32>
    %64 = vector.extract %63[0, 0, 0] : f32 from vector<1x1x1xf32>
    %65 = tpu.iota {dimensions = array<i32: 2>} : vector<1x8x128xi32>
    %66 = tpu.iota {dimensions = array<i32: 1>} : vector<1x8x128xi32>
    %c0_i32 = arith.constant 0 : i32
    %67 = vector.broadcast %c0_i32 : i32 to vector<1x8x128xi32>
    %68 = arith.cmpi eq, %66, %67 : vector<1x8x128xi32>
    %c1_i32 = arith.constant 1 : i32
    %69 = vector.broadcast %c1_i32 : i32 to vector<1x8x128xi32>
    %70 = arith.cmpi eq, %65, %69 : vector<1x8x128xi32>
    %c2_i32 = arith.constant 2 : i32
    %71 = vector.broadcast %c2_i32 : i32 to vector<1x8x128xi32>
    %72 = arith.cmpi eq, %65, %71 : vector<1x8x128xi32>
    %73 = vector.broadcast %64 : f32 to vector<1x8x128xf32>
    %74 = vector.broadcast %54 : f32 to vector<1x8x128xf32>
    %75 = arith.select %72, %73, %74 : vector<1x8x128xi1>, vector<1x8x128xf32>
    %76 = vector.broadcast %59 : f32 to vector<1x8x128xf32>
    %77 = arith.select %70, %76, %75 : vector<1x8x128xi1>, vector<1x8x128xf32>
    %c3_i32 = arith.constant 3 : i32
    %78 = vector.broadcast %c3_i32 : i32 to vector<1x8x128xi32>
    %79 = arith.cmpi slt, %65, %78 : vector<1x8x128xi32>
    %80 = arith.andi %68, %79 : vector<1x8x128xi1>
    %cst_21 = arith.constant 0.000000e+00 : f32
    %81 = vector.broadcast %cst_21 : f32 to vector<1x8x128xf32>
    %82 = arith.select %80, %77, %81 : vector<1x8x128xi1>, vector<1x8x128xf32>
    %c0_22 = arith.constant 0 : index
    %c0_23 = arith.constant 0 : index
    %c0_24 = arith.constant 0 : index
    %83 = vector.load %arg6[%c0_22, %c0_23, %c0_24] : memref<1x8x128xf32, #tpu.memory_space<vmem>>, vector<1x8x128xf32>
    tpu.vector_store %arg6[%c0_22, %c0_23, %c0_24], %82 {strides = array<i32>} : memref<1x8x128xf32, #tpu.memory_space<vmem>>, vector<1x8x128xf32>,
    return
  }
  func.func @transform_0(%arg0: i32) -> (i32, i32) {
    %c0_i32 = arith.constant 0 : i32
    %c0_i32_0 = arith.constant 0 : i32
    return %arg0, %c0_i32 : i32, i32
  }
  func.func @transform_1(%arg0: i32) -> (i32, i32) {
    %c0_i32 = arith.constant 0 : i32
    %c0_i32_0 = arith.constant 0 : i32
    return %arg0, %c0_i32 : i32, i32
  }
  func.func @transform_2(%arg0: i32) -> (i32, i32) {
    %c0_i32 = arith.constant 0 : i32
    %c0_i32_0 = arith.constant 0 : i32
    return %arg0, %c0_i32 : i32, i32
  }
  func.func @transform_3(%arg0: i32) -> (i32, i32) {
    %c0_i32 = arith.constant 0 : i32
    %c0_i32_0 = arith.constant 0 : i32
    return %arg0, %c0_i32 : i32, i32
  }
  func.func @transform_4(%arg0: i32) -> (i32, i32) {
    %c0_i32 = arith.constant 0 : i32
    %c0_i32_0 = arith.constant 0 : i32
    return %arg0, %c0_i32 : i32, i32
  }
  func.func @transform_5(%arg0: i32) -> (i32, i32, i32) {
    %c0_i32 = arith.constant 0 : i32
    %c0_i32_0 = arith.constant 0 : i32
    %c0_i32_1 = arith.constant 0 : i32
    return %arg0, %c0_i32, %c0_i32_0 : i32, i32, i32
  }
}

</mosaic_0001>

<bundles_post_ra>
// kernel: tpu_custom_call.1
= control target key start
LH: loop header
LB: loop body
LE: loop exit
PB: predicated region body
PF: predicated region fallthrough
CT: control target
= control target key end

     0   :  { %s1129_s0 = inlined_call_operand.vmem [shape: f32[16,1], index: 0, kind: input, shape index: {}]   ;;  %s1130_s1 = inlined_call_operand.vmem [shape: f32[16,32], index: 1, kind: input, shape index: {}]   ;;  %s1131_s2 = inlined_call_operand.hbm [shape: f32[16,32], index: 2, kind: input, shape index: {}]   ;;  %s1132_s3 = inlined_call_operand.hbm [shape: f32[16,32], index: 3, kind: input, shape index: {}]   ;;  %s1133_s4 = inlined_call_operand.hbm [shape: f32[16,32], index: 4, kind: input, shape index: {}]   ;;  %s1134_s5 = inlined_call_operand.hbm [shape: f32[2,8,128], index: 5, kind: output, shape index: {}]  }
   0x1   :  { %1141 = sst [smem:[#allocation15_spill]] %s1131_s2 }
   0x2   :  { %1142 = sst [smem:[#allocation16_spill]] %s1132_s3 }
   0x3   :  { %10 = vsyncpa [#allocation3], 0 }
   0x4   :  { %12 = vsyncpa [#allocation3 + $0x1], 0 }
   0x5   :  { %13 = vsyncpa [#allocation6], 0 }
   0x6   :  { %15 = vsyncpa [#allocation6 + $0x1], 0 }
   0x7   :  { %16 = vsyncpa [#allocation4], 0 }
   0x8   :  { %18 = vsyncpa [#allocation4 + $0x1], 0  ;;  %s891_s18 = smov 0   ;;  %s893_s19 = smov 0  }
   0x9   :  { %s895_s20 = smov 0   ;;  %s897_s21 = smov 0  }
   0xa LB: > { %1143 = sst [smem:[#allocation12_spill]] %s850_s20  ;;  %s912_s22 = sadd.s32 4294967295, %s854_s21   ;;  %s854_s21 = sphi %s897_s21, %s1161_s21   ;;  %s850_s20 = sphi %s895_s20, %s1163_s20   ;;  %s846_s19 = sphi %s893_s19, %s1165_s19   ;;  %s842_s18 = sphi %s891_s18, %s1164_s18  }
   0xb   : > { %s611_s23 = sadd.s32 4294967294, %s854_s21   ;;  %s916_s24 = sadd.s32 1, %s854_s21  }
   0xc   : > { %1144 = sst [smem:[#allocation13_spill]] %s916_s24  ;;  %s83_s25 = sadd.s32 1, %s850_s20 }
   0xd   : > { %s80_s26 = ssub.s32 %s854_s21, %s916_s24  ;;  %p90_p0 = scmp.ne.s32.totalorder %s850_s20, %s846_s19 }
   0xe   : > { %p81_p1 = scmp.eq.s32.totalorder %s80_s26, 0  ;;  %p91_p2 = scmp.eq.s32.totalorder %s854_s21, 0 }
   0xf   : > { %p96_p3 = scmp.ne.s32.totalorder %s846_s19, %s842_s18  ;;  %p97_p4 = scmp.eq.s32.totalorder %s912_s22, 0 }
  0x10   : > { %s928_s27 = scalar_select %p81_p1, %s850_s20, %s83_s25  }
  0x11   : > { %p92_p5 = por %p91_p2, %p90_p0  ;;  %p930_p6 = por %p97_p4, %p96_p3 }
  0x12   : > { %1145 = sst [smem:[#allocation14_spill]] %s928_s27  ;;  %p172_p7 = scmp.eq.s32.totalorder %s912_s22, 1 }
  0x13   : > { %s1146_s28 = scalar_select %p930_p6, 1, 0 }
  0x14   : > { %p178_p8 = scmp.eq.s32.totalorder %s611_s23, 1  ;;  %p661_p10 = scmp.lt.s32.totalorder %s854_s21, 2 }
  0x15   : > { %p937_p11 = por %p172_p7, %p90_p0  ;;  %s1135_s6 = sand.u32 1, %s850_s20  }
  0x16   : > { %p941_p12 = por %p178_p8, %p96_p3  ;;  %s947_s7 = sshll.u32 %s854_s21, 7 }
  0x17   : > { %s1147_s29 = scalar_select %p937_p11, 1, 0 }
  0x18   : > { %s1148_s30 = scalar_select %p941_p12, 1, 0 }
  0x19   : > { %s951_s8 = sshll.u32 %s1135_s6, 3  ;;  %p953_p13 = pnand %p661_p10, %p92_p5 }
  0x1a   : > { %s230_s10 = sand.u32 1, %s854_s21   ;;  %s1150_s3 = sld [smem:[#allocation16_spill]] }
  0x1b   : > { %s234_s14 = scalar_lea.vmem [#allocation5], %s951_s8  ;;  %s966_s16 = scalar_lea.sflag [#allocation6], %s230_s10 }
  0x1c   : > { %s241_s15 = sshll.u32 %s234_s14, 4  ;;  %p972_p2 = pneg %p953_p13  ;;  %s242_s15 = int_to_ptr.vmem [resolvable:$true] %s241_s15 }
  0x20   : > { %s962_s13 = scalar_lea.hbm %s1150_s3, %s947_s7  ;;  %s707_s11 = scalar_lea.hbm %s1150_s3, 256 }
  0x21   : > { %s702_s17 = scalar_lea.hbm %s962_s13, 128  ;;  %p708_p5 = scmp.lt.s32.totalorder %s962_s13, %s1150_s3 }
  0x22   : > { %p703_p1 = scmp.ne.s32.totalorder %s962_s13, %s702_s17  ;;  %p709_p7 = scmp.lt.s32.totalorder %s707_s11, %s702_s17 }
  0x24   : > { %p705_p3 = pnand %p972_p2, %p703_p1  ;;  %p710_p8 = por %p709_p7, %p708_p5 }
  0x26   : > { %p706_p4 = pneg %p705_p3 }
  0x28   : > { %p711_p10 = pnand %p710_p8, %p706_p4 }
  0x2a   : > { %714 = shalt.err (!%p711_p10)
}
  0x2b   : > { %s715_s10 = scalar_lea.vmem %s242_s15, 128  ;;  %s856_s6 = smov [#allocation5]  }
  0x2c   : > { %p716_p9 = scmp.ne.s32.totalorder %s242_s15, %s715_s10  ;;  %s720_s27 = sshll.u32 %s856_s6, 4  ;;  %s721_s27 = int_to_ptr.vmem [resolvable:$false] %s720_s27 }
  0x2d   : > { %s722_s24 = scalar_lea.vmem %s721_s27, 256  ;;  %p723_p1 = scmp.lt.s32.totalorder %s242_s15, %s721_s27 }
  0x2e   : > { %p718_p0 = pnand %p716_p9, %p972_p2  ;;  %p724_p3 = scmp.lt.s32.totalorder %s722_s24, %s715_s10 }
  0x30   : > { %p719_p12 = pneg %p718_p0  ;;  %p725_p11 = por %p724_p3, %p723_p1 }
  0x32   : > { %p726_p6 = pnand %p725_p11, %p719_p12 }
  0x34   : > { %729 = shalt.err (!%p726_p6)
}
  0x35   : > { %653 = dma.hbm_to_vmem [thread:$0]  (!%p953_p13), %s962_s13, 128, %s242_s15, %s966_s16  }
  0x36   : > { %p264_p9 = scmp.lt.s32.totalorder %s854_s21, 3  ;;  %s1152_s2 = sld [smem:[#allocation15_spill]] }
  0x37   : > { %p1153_p0 = scmp.ge.s32.totalorder %s854_s21, 1  ;;  %s216_s25 = scalar_lea.vmem [#allocation2], %s951_s8 }
  0x38   : > { %s223_s26 = sshll.u32 %s216_s25, 4  ;;  %s1155_s11 = sand.u32 1, %s850_s20   ;;  %s224_s26 = int_to_ptr.vmem [resolvable:$true] %s223_s26 }
  0x39   : > { %p1000_p6 = pnand %p1153_p0, %p264_p9  ;;  %s213_s12 = scalar_lea.sflag [#allocation3], %s1155_s11 }
  0x3b   : > { %s1154_s24 = scalar_select %p1000_p6, 1, 0 }
  0x3c   : > { %s996_s27 = scalar_lea.hbm %s1152_s2, %s947_s7  ;;  %s735_s10 = scalar_lea.hbm %s1152_s2, 256 }
  0x3d   : > { %s730_s13 = scalar_lea.hbm %s996_s27, 128  ;;  %p736_p5 = scmp.lt.s32.totalorder %s996_s27, %s1152_s2 }
  0x3e   : > { %p731_p11 = scmp.ne.s32.totalorder %s996_s27, %s730_s13  ;;  %p737_p7 = scmp.lt.s32.totalorder %s735_s10, %s730_s13 }
  0x40   : > { %p733_p12 = pnand %p731_p11, %p972_p2  ;;  %p738_p8 = por %p737_p7, %p736_p5 }
  0x42   : > { %p734_p4 = pneg %p733_p12 }
  0x44   : > { %p739_p10 = pnand %p738_p8, %p734_p4 }
  0x46   : > { %742 = shalt.err (!%p739_p10)
}
  0x47   : > { %s743_s25 = scalar_lea.vmem %s224_s26, 128  ;;  %s857_s11 = smov [#allocation2]  }
  0x48   : > { %p744_p1 = scmp.ne.s32.totalorder %s224_s26, %s743_s25  ;;  %s748_s3 = sshll.u32 %s857_s11, 4  ;;  %s749_s3 = int_to_ptr.vmem [resolvable:$false] %s748_s3 }
  0x49   : > { %s750_s20 = scalar_lea.vmem %s749_s3, 256  ;;  %p751_p0 = scmp.lt.s32.totalorder %s224_s26, %s749_s3 }
  0x4a   : > { %p746_p3 = pnand %p744_p1, %p972_p2  ;;  %p752_p11 = scmp.lt.s32.totalorder %s750_s20, %s743_s25 }
  0x4c   : > { %p747_p9 = pneg %p746_p3  ;;  %p753_p12 = por %p752_p11, %p751_p0 }
  0x4e   : > { %p754_p6 = pnand %p753_p12, %p747_p9 }
  0x50   : > { %757 = shalt.err (!%p754_p6)
}
  0x51   : > { %650 = dma.hbm_to_vmem [thread:$0]  (!%p953_p13), %s996_s27, 128, %s224_s26, %s213_s12  }
  0x52   : > { %s257_s14 = scalar_lea.hbm %s1133_s4, %s947_s7  ;;  %s252_s10 = scalar_lea.vmem [#allocation7], %s951_s8 }
  0x53   : > { %s259_s6 = sshll.u32 %s252_s10, 4  ;;  %s758_s17 = scalar_lea.hbm %s257_s14, 128  ;;  %s260_s6 = int_to_ptr.vmem [resolvable:$true] %s259_s6 }
  0x54   : > { %p759_p4 = scmp.ne.s32.totalorder %s257_s14, %s758_s17  ;;  %s763_s25 = scalar_lea.hbm %s1133_s4, 256 }
  0x55   : > { %p764_p6 = scmp.lt.s32.totalorder %s257_s14, %s1133_s4  ;;  %p765_p8 = scmp.lt.s32.totalorder %s763_s25, %s758_s17 }
  0x56   : > { %p761_p5 = pnand %p759_p4, %p972_p2 }
  0x57   : > { %p766_p10 = por %p765_p8, %p764_p6 }
  0x58   : > { %p762_p7 = pneg %p761_p5 }
  0x5a   : > { %p767_p1 = pnand %p766_p10, %p762_p7 }
  0x5c   : > { %770 = shalt.err (!%p767_p1)
}
  0x5d   : > { %s771_s7 = scalar_lea.vmem %s260_s6, 128  ;;  %s858_s8 = smov [#allocation7]  }
  0x5e   : > { %p772_p3 = scmp.ne.s32.totalorder %s260_s6, %s771_s7  ;;  %s776_s27 = sshll.u32 %s858_s8, 4  ;;  %s777_s27 = int_to_ptr.vmem [resolvable:$false] %s776_s27 }
  0x5f   : > { %s778_s26 = scalar_lea.vmem %s777_s27, 256  ;;  %p779_p11 = scmp.lt.s32.totalorder %s260_s6, %s777_s27 }
  0x60   : > { %p774_p9 = pnand %p772_p3, %p972_p2  ;;  %p780_p12 = scmp.lt.s32.totalorder %s778_s26, %s771_s7 }
  0x62   : > { %p775_p0 = pneg %p774_p9  ;;  %p781_p4 = por %p780_p12, %p779_p11 }
  0x64   : > { %p782_p5 = pnand %p781_p4, %p775_p0 }
  0x66   : > { %785 = shalt.err (!%p782_p5)
}
  0x67   : > { %656 = dma.hbm_to_vmem [thread:$0]  (!%p953_p13), %s257_s14, 128, %s260_s6, %s966_s16  }
  0x68   : > { %p1156_p7 = scmp.ne.s32.totalorder %s1154_s24, 0 }
  0x69   : > { %s1044_s2 = sand.u32 (!%p1156_p7), 1, %s846_s19   ;;  %p1157_p2 = scmp.ne.s32.totalorder (!%p1156_p7), %s1146_s28, 0 }
  0x6a   : > { %268 = sbr.rel (%p1156_p7) target bundleno = 519 (0x207), region = 40  ;;  %s1047_s23 = sshll.u32 (!%p1156_p7), %s1044_s2, 3 }
  0x6b   : > { %s271_s12 = scalar_lea.sflag (!%p1156_p7), [#allocation3], %s1044_s2  ;;  %s274_s13 = scalar_lea.vmem (!%p1156_p7), [#allocation2], %s1047_s23 }
  0x6f   : > { %829 = dma.done.wait (%p1157_p2), %s271_s12, 128  }
  0x70   : > { %831 = vsyncadd (%p1157_p2), %s271_s12, 4294967168  ;;  %s279_s9 = sand.u32 1, %s912_s22   ;;  %s283_s24 = scalar_lea.vmem [#allocation5], %s1047_s23 }
  0x71   : > { %s280_s16 = scalar_lea.sflag [#allocation6], %s279_s9 }
  0x72   : > { %833 = dma.done.wait (%p1157_p2), %s280_s16, 256  }
  0x73   : > { %835 = vsyncadd (%p1157_p2), %s280_s16, 4294967040  ;;  %p337_p13 = scmp.lt.s32.totalorder %s912_s22, 1  ;;  %v346_v0 = vld [vmem:[%s274_s13] sm:$0xff]  ;;  %s292_s3 = scalar_lea.vmem [#allocation7], %s1047_s23  ;;  %v347_v5 = vld [vmem:[%s283_s24] sm:$0xff]  ;;  %vm360_vm0 = vcmask 261120   ;;  %v351_v16 = vlaneseq }
  0x74   : > { %v348_v1 = vld [vmem:[%s292_s3] sm:$0xff]  ;;  %s627_s28 = sshll.u32 %s912_s22, 3  ;;  %v859_v24 = vmov 0.0   ;;  %vm413_vm2 = vcmask 7168   ;;  %s630_s27 = sshll.u32 %s912_s22, 7 }
  0x75   : > { %s1063_s15 = scalar_select %p337_p13, %s912_s22, 1  ;;  %v382_v3 = vsub.f32 %v346_v0, %v348_v1  ;;  %v364_v7 = vsub.f32 %v347_v5, %v348_v1  ;;  %v1074_v17 = vshrl.u32 %v351_v16, 7  ;;  %v353_v18 = vstv %s627_s28 }
  0x76   : > { %s336_s12 = scalar_lea.vmem [#allocation8], %s1047_s23  ;;  %s1092_s24 = scalar_lea.hbm %s1134_s5, %s630_s27 }
  0x77   : > { %s625_s14 = sshll.u32 %s1063_s15, 3  ;;  %v383_v8 = vmul.f32 %v382_v3, %v382_v3  ;;  %v365_v11 = vmul.f32 %v364_v7, %v364_v7  ;;  %v354_v19 = vadd.s32 %v353_v18, %v1074_v17  ;;  %vm448_vm9 = vcmp.eq.s32.totalorder %v1074_v17, 0  ;;  %s474_s13 = sshll.u32 %s336_s12, 4  ;;  %s475_s13 = int_to_ptr.vmem [resolvable:$true] %s474_s13 }
  0x78   : > { %s344_s17 = scalar_lea.vmem %s1130_s1, %s625_s14  ;;  %s340_s11 = scalar_lea.vmem %s1129_s0, %s625_s14 }
  0x79   : > { %v345_v2 = vld [vmem:[%s344_s17] sm:$0xff]  ;;  %v384_v12 = vsel %vm360_vm0, %v383_v8, 0.0  ;;  %v366_v15 = vsel %vm360_vm0, %v365_v11, 0.0  ;;  %vm355_vm1 = vcmp.lt.s32.totalorder %v354_v19, 16  ;;  %v447_v19 = vand.u32 127, %v351_v16  ;;  %s461_s22 = scalar_lea.sflag [#allocation4], %s1044_s2 }
  0x7a   : > { %v358_v4 = vsub.f32 %v345_v2, %v346_v0  ;;  %v369_v6 = vsub.f32 %v345_v2, %v347_v5  ;;  %385 = vadd.xlane.f32.xlu1 %v384_v12  ;;  %v628_v25 = vsel %vm355_vm1, 1.0, %v859_v24  ;;  %v349_v43 = vld [vmem:[%s340_s11] sm:$0xff]  ;;  %s786_s15 = scalar_lea.vmem %s475_s13, 128  ;;  %p1158_p8 = scmp.ne.s32.totalorder %s1147_s29, 0 }
  0x7b   : > { %v409_v46 = vsub.f32 1.0, %v349_v43  ;;  %vm456_vm10 = vcmp.lt.s32.totalorder %v447_v19, 3  ;;  %vm450_vm11 = vcmp.eq.s32.totalorder %v447_v19, 2  ;;  %vm449_vm12 = vcmp.eq.s32.totalorder %v447_v19, 1  ;;  %p787_p6 = scmp.ne.s32.totalorder %s475_s13, %s786_s15  ;;  %s860_s23 = smov [#allocation8]  }
  0x7c   : > { %v359_v9 = vmul.f32 %v358_v4, %v358_v4  ;;  %v370_v10 = vmul.f32 %v369_v6, %v369_v6  ;;  %vm457_vm13 = vmand %vm448_vm9, %vm456_vm10  ;;  %s790_s14 = sshll.u32 %s860_s23, 4  ;;  %s791_s14 = int_to_ptr.vmem [resolvable:$false] %s790_s14 }
  0x7d   : > { %p788_p10 = pnand %p787_p6, %p1158_p8  ;;  %s792_s10 = scalar_lea.vmem %s791_s14, 256 }
  0x7e   : > { %v361_v13 = vsel %vm360_vm0, %v359_v9, 0.0  ;;  %v371_v14 = vsel %vm360_vm0, %v370_v10, 0.0  ;;  %367 = vadd.xlane.f32.xlu1 %v366_v15  ;;  %p793_p3 = scmp.lt.s32.totalorder %s475_s13, %s791_s14  ;;  %p794_p9 = scmp.lt.s32.totalorder %s792_s10, %s786_s15 }
  0x7f   : > { %362 = vadd.xlane.f32.xlu0 %v361_v13  ;;  %p789_p1 = pneg %p788_p10 }
  0x80   : > { %p795_p0 = por %p794_p9, %p793_p3 }
  0x82   : > { %p796_p11 = pnand %p795_p0, %p789_p1 }
  0x83   : > { %372 = vadd.xlane.f32.xlu0 %v371_v14 }
 0x103   : > { %v386_v20 = vpop.xlane.xlu1 %385 }
 0x104   : > { %v387_v22 = vadd.f32 1e-09, %v386_v20 }
 0x106   : > { %696 = vrsqrt.f32 %v387_v22  ;;  %vm390_vm5 = vcmp.eq.f32.partialorder %v387_v22, inf  ;;  %v393_v45 = vand.u32 2147483648, %v387_v22  ;;  %vm392_vm8 = vcmp.eq.f32.partialorder %v387_v22, 0.0 }
 0x107   : > { %v368_v27 = vpop.xlane.xlu1 %367 }
 0x108   : > { %v363_v21 = vpop.xlane.xlu0 %362  ;;  %v424_v29 = vmul.f32 %v628_v25, %v368_v27 }
 0x109   : > { %v397_v23 = vadd.f32 1e-09, %v363_v21  ;;  %v408_v52 = vmul.f32 %v363_v21, %v349_v43 }
 0x10a   : > { %v425_v30 = vsel %vm413_vm2, %v424_v29, 0.0 }
 0x10b   : > { %698 = vrsqrt.f32 %v397_v23  ;;  %426 = vadd.xlane.f32.xlu1 %v425_v30  ;;  %vm400_vm3 = vcmp.eq.f32.partialorder %v397_v23, inf  ;;  %v403_v35 = vand.u32 2147483648, %v397_v23  ;;  %vm402_vm4 = vcmp.eq.f32.partialorder %v397_v23, 0.0 }
 0x10c   : > { %v373_v26 = vpop.xlane.xlu0 %372 }
 0x10d   : > { %v374_v28 = vadd.f32 1e-09, %v373_v26 }
 0x10f   : > { %700 = vrsqrt.f32 %v374_v28  ;;  %vm377_vm6 = vcmp.eq.f32.partialorder %v374_v28, inf  ;;  %v380_v41 = vand.u32 2147483648, %v374_v28  ;;  %vm379_vm7 = vcmp.eq.f32.partialorder %v374_v28, 0.0 }
 0x113   : > { %v697_v31 = vpop.eup %696 }
 0x114   : > { %v389_v34 = vmul.f32 %v697_v31, %v387_v22 }
 0x116   : > { %v391_v42 = vsel %vm390_vm5, %v387_v22, %v389_v34 }
 0x117   : > { %v394_v49 = vsel %vm392_vm8, %v393_v45, %v391_v42 }
 0x118   : > { %v699_v32 = vpop.eup %698 }
 0x119   : > { %v399_v33 = vmul.f32 %v699_v32, %v397_v23 }
 0x11b   : > { %v401_v37 = vsel %vm400_vm3, %v397_v23, %v399_v33 }
 0x11c   : > { %v701_v36 = vpop.eup %700  ;;  %v404_v38 = vsel %vm402_vm4, %v403_v35, %v401_v37 }
 0x11d   : > { %v376_v39 = vmul.f32 %v701_v36, %v374_v28  ;;  %v405_v40 = vsub.f32 1.0, %v404_v38 }
 0x11f   : > { %v378_v44 = vsel %vm377_vm6, %v374_v28, %v376_v39  ;;  %v406_v47 = vmax.f32 %v405_v40, 0.0 }
 0x120   : > { %v381_v48 = vsel %vm379_vm7, %v380_v41, %v378_v44 }
 0x121   : > { %v407_v50 = vmul.f32 %v406_v47, %v406_v47  ;;  %v395_v51 = vsub.f32 %v381_v48, %v394_v49 }
 0x123   : > { %v410_v53 = vmul.f32 %v409_v46, %v407_v50  ;;  %v396_v55 = vmul.f32 %v395_v51, %v395_v51 }
 0x125   : > { %v411_v54 = vadd.f32 %v410_v53, %v408_v52  ;;  %v435_v58 = vmul.f32 %v628_v25, %v396_v55 }
 0x127   : > { %v412_v56 = vmul.f32 %v628_v25, %v411_v54  ;;  %v436_v59 = vsel %vm413_vm2, %v435_v58, 0.0 }
 0x129   : > { %v414_v57 = vsel %vm413_vm2, %v412_v56, 0.0 }
 0x12a   : > { %415 = vadd.xlane.f32.xlu0 %v414_v57 }
 0x12e   : > { %437 = vadd.xlane.f32.xlu0 %v436_v59 }
 0x194   : > { %v427_v60 = vpop.xlane.xlu1 %426 }
 0x195   : > { %v428_v61 = vrot.slane %v427_v60, 4 }
 0x197   : > { %v429_v62 = vadd.f32 %v428_v61, %v427_v60 }
 0x199   : > { %v430_v63 = vrot.slane %v429_v62, 2 }
 0x19b   : > { %v431_v3 = vadd.f32 %v430_v63, %v429_v62 }
 0x19d   : > { %v432_v9 = vrot.slane %v431_v3, 1 }
 0x19f   : > { %v433_v14 = vadd.f32 %v432_v9, %v431_v3 }
 0x1b3   : > { %v416_v0 = vpop.xlane.xlu0 %415 }
 0x1b4   : > { %v417_v1 = vrot.slane %v416_v0, 4 }
 0x1b6   : > { %v418_v2 = vadd.f32 %v417_v1, %v416_v0 }
 0x1b7   : > { %v438_v4 = vpop.xlane.xlu0 %437 }
 0x1b8   : > { %v419_v5 = vrot.slane %v418_v2, 2  ;;  %v439_v6 = vrot.slane %v438_v4, 4 }
 0x1ba   : > { %v440_v7 = vadd.f32 %v439_v6, %v438_v4  ;;  %v420_v8 = vadd.f32 %v419_v5, %v418_v2 }
 0x1bc   : > { %v441_v10 = vrot.slane %v440_v7, 2  ;;  %v421_v11 = vrot.slane %v420_v8, 1 }
 0x1be   : > { %v442_v12 = vadd.f32 %v441_v10, %v440_v7  ;;  %v422_v13 = vadd.f32 %v421_v11, %v420_v8 }
 0x1c0   : > { %633 = vpush %v422_v13  ;;  %v443_v15 = vrot.slane %v442_v12, 1 }
 0x1c1   : > { %635 = vpush %v433_v14 }
 0x1c2   : > { %v444_v18 = vadd.f32 %v443_v15, %v442_v12 }
 0x1c4   : > { %637 = vpush %v444_v18 }
 0x1f1   : > { %s634_s7 = spop %633 }
 0x1f2   : > { %s636_s8 = spop %635  ;;  %v452_v20 = vstv %s634_s7 }
 0x1f3   : > { %v454_v22 = vstv %s636_s8 }
 0x1f5   : > { %s638_s26 = spop %637 }
 0x1f6   : > { %v451_v21 = vstv %s638_s26 }
 0x1f7   : > { %v453_v23 = vsel %vm450_vm11, %v451_v21, %v452_v20 }
 0x1f8   : > { %v455_v24 = vsel %vm449_vm12, %v454_v22, %v453_v23 }
 0x1f9   : > { %v458_v16 = vsel %vm457_vm13, %v455_v24, 0.0 }
 0x1fa   : > { %459 = vst [vmem:[%s336_s12] sm:$0xff] %v458_v16 }
 0x1fb   : > { %799 = shalt.err (!%p796_p11)
}
 0x1fc   : > { %s800_s6 = scalar_lea.hbm %s1092_s24, 128  ;;  %s804_s3 = scalar_lea.hbm %s1134_s5, 256 }
 0x1fd   : > { %p801_p12 = scmp.ne.s32.totalorder %s1092_s24, %s800_s6  ;;  %p805_p7 = scmp.lt.s32.totalorder %s1092_s24, %s1134_s5 }
 0x1fe   : > { %p806_p2 = scmp.lt.s32.totalorder %s804_s3, %s800_s6 }
 0x1ff   : > { %p802_p4 = pnand %p801_p12, %p1158_p8 }
 0x200   : > { %p807_p13 = por %p806_p2, %p805_p7 }
 0x201   : > { %p803_p5 = pneg %p802_p4 }
 0x203   : > { %p808_p6 = pnand %p807_p13, %p803_p5 }
 0x205   : > { %811 = shalt.err (!%p808_p6)
}
 0x206   : > { %645 = dma.vmem_to_hbm [thread:$0]  (%p1158_p8), %s475_s13, 128, %s1092_s24, %s461_s22  }
 0x207 PF: > { %s486_s25 = sand.u32 1, %s842_s18   ;;  %p1159_p10 = scmp.ne.s32.totalorder %s1148_s30, 0 }
 0x208   : > { %p1160_p1 = scmp.ge.s32.totalorder %s854_s21, 2  ;;  %s487_s11 = scalar_lea.sflag [#allocation4], %s486_s25 }
 0x20a   : > { %p658_p3 = pnand %p1160_p1, %p1159_p10 }
 0x20c   : > { %p659_p9 = pneg %p658_p3 }
 0x20e   : > { %837 = dma.done.wait (%p659_p9), %s487_s11, 128  }
 0x20f   : > { %839 = vsyncadd (%p659_p9), %s487_s11, 4294967168  ;;  %s1161_s21 = sld [smem:[#allocation13_spill]]  ;;  %s1164_s18 = smov %s846_s19 }
 0x210   : > { %s1162_s7 = sld [smem:[#allocation12_spill]] }
 0x211   : > { %s1163_s20 = sld [smem:[#allocation14_spill]] }
 0x215   : > { %p21_p0 = scmp.ge.s32.totalorder %s1161_s21, 4  }
 0x216   : > { %s1165_s19 = smov %s1162_s7 }
 0x217   :  { %23 = sbr.rel (!%p21_p0) target bundleno = 10 (0xa), region = 115 }
 0x21c   :  { %492 = vsyncpa [#allocation3], 1 }
 0x21d   :  { %494 = vsyncpa [#allocation3 + $0x1], 1 }
 0x21e   :  { %495 = vsyncpa [#allocation6], 1 }
 0x21f   :  { %497 = vsyncpa [#allocation6 + $0x1], 1 }
 0x220   :  { %498 = vsyncpa [#allocation4], 1 }
 0x221   :  { %500 = vsyncpa [#allocation4 + $0x1], 1 }

</bundles_post_ra>
